<compile_context>
chip_gen: v6e
topology: v6e:2x2x1
jax: 0.10.0
libtpu: 0.0.40
codegen_flags: <defaults>
</compile_context>

<pallas_src>
import jax
import jax.numpy as jnp
from jax.experimental import pallas as pl
from jax.experimental.pallas import tpu as pltpu

NUM_CLASSES = 28
INPUT_DIM = 21 * 3        # 63
INPUT_DIM_PAD = 64        # lane-friendly K for the first GEMM
HIDDEN_DIM = 256
OUT_PAD = 128             # lane-dense padded logits width
WALL_COLS = 2 * HIDDEN_DIM + OUT_PAD   # 640: [w2 | w3 | w4_pad]
BN_EPS = 1e-5

# Row layout of the packed per-feature vector array (f32, [8, 256]).
ROW_GAMMA, ROW_BETA, ROW_B2, ROW_B3, ROW_B4 = 0, 1, 2, 3, 4


def ctrgcn_kernel(x_ref, w1_ref, wall_ref, vec_ref, o_ref):
    # fc1 (f32 operands; bias dropped -- it cancels exactly under training-mode
    # BatchNorm mean subtraction).
    h = jnp.dot(x_ref[...], w1_ref[...], preferred_element_type=jnp.float32)

    # BatchNorm1d, training-mode batch statistics, two-pass (robust) variance.
    mean = jnp.mean(h, axis=0, keepdims=True)                  # [1, H]
    hc = h - mean
    var = jnp.mean(hc * hc, axis=0, keepdims=True)             # [1, H]
    gamma = vec_ref[ROW_GAMMA:ROW_GAMMA + 1, :]
    beta = vec_ref[ROW_BETA:ROW_BETA + 1, :]
    scale = gamma * jax.lax.rsqrt(var + BN_EPS)                # EUP rsqrt
    h = jnp.maximum(hc * scale + beta, 0.0)                    # BN + ReLU

    # gcn1 + ReLU (bf16 MXU operands, f32 accumulation).
    w2 = wall_ref[:, 0:HIDDEN_DIM]
    h = jnp.dot(h.astype(jnp.bfloat16), w2,
                preferred_element_type=jnp.float32) + vec_ref[ROW_B2:ROW_B2 + 1, :]
    h = jnp.maximum(h, 0.0)

    # gcn2 + ReLU.
    w3 = wall_ref[:, HIDDEN_DIM:2 * HIDDEN_DIM]
    h = jnp.dot(h.astype(jnp.bfloat16), w3,
                preferred_element_type=jnp.float32) + vec_ref[ROW_B3:ROW_B3 + 1, :]
    h = jnp.maximum(h, 0.0)

    # fc2 -> lane-dense padded logits [B, 128] (unmasked stores).
    w4 = wall_ref[:, 2 * HIDDEN_DIM:WALL_COLS]
    o_ref[...] = jnp.dot(h.astype(jnp.bfloat16), w4,
                         preferred_element_type=jnp.float32) \
        + vec_ref[ROW_B4:ROW_B4 + 1, 0:OUT_PAD]


def prepare_params(p):
    """Pad + pack master float32 params into the kernel's device layout."""
    # fc1 weight kept in f32 (tiny GEMM, numerics feed the BN stats).
    w1p = jnp.zeros((INPUT_DIM_PAD, HIDDEN_DIM), jnp.float32)
    w1p = w1p.at[:INPUT_DIM, :].set(p["w1"])

    # One lane-concatenated bf16 weight slab: [w2 | w3 | w4 (zero-padded)].
    wall = jnp.zeros((HIDDEN_DIM, WALL_COLS), jnp.float32)
    wall = wall.at[:, 0:HIDDEN_DIM].set(p["w2"])
    wall = wall.at[:, HIDDEN_DIM:2 * HIDDEN_DIM].set(p["w3"])
    wall = wall.at[:, 2 * HIDDEN_DIM:2 * HIDDEN_DIM + NUM_CLASSES].set(p["w4"])

    # One packed f32 array for all per-feature vectors (8 sublanes anyway).
    vecs = jnp.zeros((8, HIDDEN_DIM), jnp.float32)
    vecs = vecs.at[ROW_GAMMA:ROW_GAMMA + 1, :].set(p["gamma"])
    vecs = vecs.at[ROW_BETA:ROW_BETA + 1, :].set(p["beta"])
    vecs = vecs.at[ROW_B2:ROW_B2 + 1, :].set(p["b2"])
    vecs = vecs.at[ROW_B3:ROW_B3 + 1, :].set(p["b3"])
    vecs = vecs.at[ROW_B4:ROW_B4 + 1, 0:NUM_CLASSES].set(p["b4"])
    # NOTE: b1 is intentionally dropped (exactly cancelled by BN mean subtraction).

    return {
        "w1": w1p,                            # f32 [64, 256]
        "wall": wall.astype(jnp.bfloat16),    # bf16 [256, 640]
        "vecs": vecs,                         # f32 [8, 256]
    }


def ctrgcn_forward(x, dp):
    """x: [B, 21, 3] float32, dp: prepared (packed) params -> logits [B, 28]."""
    B = x.shape[0]
    x_flat = x.reshape(B, -1).astype(jnp.float32)                       # [B, 63]
    x_pad = jnp.pad(x_flat, ((0, 0), (0, INPUT_DIM_PAD - INPUT_DIM)))   # [B, 64]

    args = (x_pad, dp["w1"], dp["wall"], dp["vecs"])

    weight_elems = (INPUT_DIM_PAD * HIDDEN_DIM
                    + 2 * HIDDEN_DIM * HIDDEN_DIM
                    + HIDDEN_DIM * OUT_PAD)
    cost = pl.CostEstimate(
        flops=2 * B * weight_elems,
        transcendentals=HIDDEN_DIM,                               # rsqrt lane-vector
        bytes_accessed=(4 * INPUT_DIM_PAD * HIDDEN_DIM            # f32 w1
                        + 2 * HIDDEN_DIM * WALL_COLS              # bf16 packed weights
                        + 4 * 8 * HIDDEN_DIM                      # f32 packed vectors
                        + 4 * B * INPUT_DIM_PAD                   # f32 input
                        + 4 * B * OUT_PAD),                       # f32 output
    )

    vmem_spec = pl.BlockSpec(memory_space=pltpu.MemorySpace.VMEM)
    out_padded = pl.pallas_call(
        ctrgcn_kernel,
        out_shape=jax.ShapeDtypeStruct((B, OUT_PAD), jnp.float32),
        in_specs=[vmem_spec] * len(args),
        out_specs=vmem_spec,
        cost_estimate=cost,
    )(*args)
    return out_padded[:, :NUM_CLASSES]


def make_params(key):
    ks = jax.random.split(key, 10)

    def lin(k, fan_in, fan_out):
        # weights stored as (in_features, out_features): Linear is x @ W + b.
        return 0.1 * jax.random.normal(k, (fan_in, fan_out), jnp.float32)

    return {
        "w1": lin(ks[0], INPUT_DIM, HIDDEN_DIM),
        "b1": 0.01 * jax.random.normal(ks[1], (1, HIDDEN_DIM), jnp.float32),
        "gamma": 1.0 + 0.05 * jax.random.normal(ks[2], (1, HIDDEN_DIM), jnp.float32),
        "beta": 0.02 * jax.random.normal(ks[3], (1, HIDDEN_DIM), jnp.float32),
        "w2": lin(ks[4], HIDDEN_DIM, HIDDEN_DIM),
        "b2": 0.01 * jax.random.normal(ks[5], (1, HIDDEN_DIM), jnp.float32),
        "w3": lin(ks[6], HIDDEN_DIM, HIDDEN_DIM),
        "b3": 0.01 * jax.random.normal(ks[7], (1, HIDDEN_DIM), jnp.float32),
        "w4": lin(ks[8], HIDDEN_DIM, NUM_CLASSES),
        "b4": 0.01 * jax.random.normal(ks[9], (1, NUM_CLASSES), jnp.float32),
    }


def ctrgcn_reference(x, p):
    """Pure-JAX float32 reference (module semantics, training-mode BN, with b1)."""
    h = x.reshape(x.shape[0], -1) @ p["w1"] + p["b1"]
    mean = jnp.mean(h, axis=0, keepdims=True)
    var = jnp.mean((h - mean) ** 2, axis=0, keepdims=True)
    h = (h - mean) / jnp.sqrt(var + BN_EPS) * p["gamma"] + p["beta"]
    h = jnp.maximum(h, 0.0)
    h = jnp.maximum(h @ p["w2"] + p["b2"], 0.0)
    h = jnp.maximum(h @ p["w3"] + p["b3"], 0.0)
    return h @ p["w4"] + p["b4"]


if __name__ == "__main__":
    key = jax.random.PRNGKey(0)
    k_x, k_p = jax.random.split(key)

    B = 8
    x = jax.random.normal(k_x, (B, 21, 3), jnp.float32)   # raw skeleton input
    params = make_params(k_p)
    dev_params = prepare_params(params)

    out = ctrgcn_forward(x, dev_params)
    out = jax.block_until_ready(out)

    ref = ctrgcn_reference(x, params)
    assert out.shape == (B, NUM_CLASSES)
    max_err = float(jnp.max(jnp.abs(out - ref)))
    # fc1/BN in f32; bf16 MXU operands downstream with f32 accumulation ->
    # small, bounded quantization error.
    assert max_err < 0.1, f"mismatch vs reference, max abs err = {max_err}"

    print("KERNEL_OK")
</pallas_src>

<mosaic_0001>
module attributes {stable_mosaic.version = 11 : i64} {
  func.func @ctrgcn_kernel(%arg0: memref<8x64xf32, #tpu.memory_space<vmem>>, %arg1: memref<64x256xf32, #tpu.memory_space<vmem>>, %arg2: memref<256x640xbf16, #tpu.memory_space<vmem>>, %arg3: memref<8x256xf32, #tpu.memory_space<vmem>>, %arg4: memref<8x128xf32, #tpu.memory_space<vmem>>) attributes {dimension_semantics = [], scalar_prefetch = 0 : i64, scratch_operands = 0 : i64, tpu.core_type = #tpu.core_type<tc>} {
    %c0 = arith.constant 0 : index
    %c0_0 = arith.constant 0 : index
    %0 = vector.load %arg0[%c0, %c0_0] : memref<8x64xf32, #tpu.memory_space<vmem>>, vector<8x64xf32>
    %c0_1 = arith.constant 0 : index
    %c0_2 = arith.constant 0 : index
    %1 = vector.load %arg1[%c0_1, %c0_2] : memref<64x256xf32, #tpu.memory_space<vmem>>, vector<64x256xf32>
    %cst = arith.constant dense<0.000000e+00> : vector<8x256xf32>
    %2 = tpu.matmul %0, %1, %cst {dimension_numbers = #tpu.dot_dimension_numbers<[1], [0], [0], [1], [0, 0, 1, 1], [], []>} : vector<8x64xf32>, vector<64x256xf32>, vector<8x256xf32> -> vector<8x256xf32>
    %cst_3 = arith.constant dense<0.000000e+00> : vector<256xf32>
    %3 = vector.multi_reduction <add>, %2, %cst_3 [0] : vector<8x256xf32> to vector<256xf32>
    %4 = vector.shape_cast %3 : vector<256xf32> to vector<1x256xf32>
    %cst_4 = arith.constant 8.000000e+00 : f32
    %5 = vector.broadcast %cst_4 : f32 to vector<1x256xf32>
    %6 = arith.divf %4, %5 : vector<1x256xf32>
    %7 = vector.broadcast %6 : vector<1x256xf32> to vector<8x256xf32>
    %8 = arith.subf %2, %7 : vector<8x256xf32>
    %9 = arith.mulf %8, %8 : vector<8x256xf32>
    %cst_5 = arith.constant dense<0.000000e+00> : vector<256xf32>
    %10 = vector.multi_reduction <add>, %9, %cst_5 [0] : vector<8x256xf32> to vector<256xf32>
    %11 = vector.shape_cast %10 : vector<256xf32> to vector<1x256xf32>
    %cst_6 = arith.constant 8.000000e+00 : f32
    %12 = vector.broadcast %cst_6 : f32 to vector<1x256xf32>
    %13 = arith.divf %11, %12 : vector<1x256xf32>
    %c0_7 = arith.constant 0 : index
    %c0_8 = arith.constant 0 : index
    %14 = vector.load %arg3[%c0_7, %c0_8] : memref<8x256xf32, #tpu.memory_space<vmem>>, vector<1x256xf32>
    %c1 = arith.constant 1 : index
    %c0_9 = arith.constant 0 : index
    %15 = vector.load %arg3[%c1, %c0_9] : memref<8x256xf32, #tpu.memory_space<vmem>>, vector<1x256xf32>
    %cst_10 = arith.constant 9.99999974E-6 : f32
    %16 = vector.broadcast %cst_10 : f32 to vector<1x256xf32>
    %17 = arith.addf %13, %16 : vector<1x256xf32>
    %18 = math.rsqrt %17 : vector<1x256xf32>
    %19 = arith.mulf %14, %18 : vector<1x256xf32>
    %20 = vector.broadcast %19 : vector<1x256xf32> to vector<8x256xf32>
    %21 = arith.mulf %8, %20 : vector<8x256xf32>
    %22 = vector.broadcast %15 : vector<1x256xf32> to vector<8x256xf32>
    %23 = arith.addf %21, %22 : vector<8x256xf32>
    %cst_11 = arith.constant 0.000000e+00 : f32
    %24 = vector.broadcast %cst_11 : f32 to vector<8x256xf32>
    %25 = arith.maximumf %23, %24 : vector<8x256xf32>
    %c0_12 = arith.constant 0 : index
    %c0_13 = arith.constant 0 : index
    %26 = vector.load %arg2[%c0_12, %c0_13] : memref<256x640xbf16, #tpu.memory_space<vmem>>, vector<256x256xbf16>
    %27 = arith.truncf %25 : vector<8x256xf32> to vector<8x256xbf16>
    %cst_14 = arith.constant dense<0.000000e+00> : vector<8x256xf32>
    %28 = tpu.matmul %27, %26, %cst_14 {dimension_numbers = #tpu.dot_dimension_numbers<[1], [0], [0], [1], [0, 0, 1, 1], [], []>} : vector<8x256xbf16>, vector<256x256xbf16>, vector<8x256xf32> -> vector<8x256xf32>
    %c2 = arith.constant 2 : index
    %c0_15 = arith.constant 0 : index
    %29 = vector.load %arg3[%c2, %c0_15] : memref<8x256xf32, #tpu.memory_space<vmem>>, vector<1x256xf32>
    %30 = vector.broadcast %29 : vector<1x256xf32> to vector<8x256xf32>
    %31 = arith.addf %28, %30 : vector<8x256xf32>
    %cst_16 = arith.constant 0.000000e+00 : f32
    %32 = vector.broadcast %cst_16 : f32 to vector<8x256xf32>
    %33 = arith.maximumf %31, %32 : vector<8x256xf32>
    %c0_17 = arith.constant 0 : index
    %c256 = arith.constant 256 : index
    %34 = vector.load %arg2[%c0_17, %c256] : memref<256x640xbf16, #tpu.memory_space<vmem>>, vector<256x256xbf16>
    %35 = arith.truncf %33 : vector<8x256xf32> to vector<8x256xbf16>
    %cst_18 = arith.constant dense<0.000000e+00> : vector<8x256xf32>
    %36 = tpu.matmul %35, %34, %cst_18 {dimension_numbers = #tpu.dot_dimension_numbers<[1], [0], [0], [1], [0, 0, 1, 1], [], []>} : vector<8x256xbf16>, vector<256x256xbf16>, vector<8x256xf32> -> vector<8x256xf32>
    %c3 = arith.constant 3 : index
    %c0_19 = arith.constant 0 : index
    %37 = vector.load %arg3[%c3, %c0_19] : memref<8x256xf32, #tpu.memory_space<vmem>>, vector<1x256xf32>
    %38 = vector.broadcast %37 : vector<1x256xf32> to vector<8x256xf32>
    %39 = arith.addf %36, %38 : vector<8x256xf32>
    %cst_20 = arith.constant 0.000000e+00 : f32
    %40 = vector.broadcast %cst_20 : f32 to vector<8x256xf32>
    %41 = arith.maximumf %39, %40 : vector<8x256xf32>
    %c0_21 = arith.constant 0 : index
    %c512 = arith.constant 512 : index
    %42 = vector.load %arg2[%c0_21, %c512] : memref<256x640xbf16, #tpu.memory_space<vmem>>, vector<256x128xbf16>
    %43 = arith.truncf %41 : vector<8x256xf32> to vector<8x256xbf16>
    %cst_22 = arith.constant dense<0.000000e+00> : vector<8x128xf32>
    %44 = tpu.matmul %43, %42, %cst_22 {dimension_numbers = #tpu.dot_dimension_numbers<[1], [0], [0], [1], [0, 0, 1, 1], [], []>} : vector<8x256xbf16>, vector<256x128xbf16>, vector<8x128xf32> -> vector<8x128xf32>
    %c4 = arith.constant 4 : index
    %c0_23 = arith.constant 0 : index
    %45 = vector.load %arg3[%c4, %c0_23] : memref<8x256xf32, #tpu.memory_space<vmem>>, vector<1x128xf32>
    %46 = vector.broadcast %45 : vector<1x128xf32> to vector<8x128xf32>
    %47 = arith.addf %44, %46 : vector<8x128xf32>
    %c0_24 = arith.constant 0 : index
    %c0_25 = arith.constant 0 : index
    %48 = vector.load %arg4[%c0_24, %c0_25] : memref<8x128xf32, #tpu.memory_space<vmem>>, vector<8x128xf32>
    tpu.vector_store %arg4[%c0_24, %c0_25], %47 {strides = array<i32>} : memref<8x128xf32, #tpu.memory_space<vmem>>, vector<8x128xf32>,
    return
  }
}

</mosaic_0001>

<bundles_post_ra>
// kernel: tpu_custom_call.1
= control target key start
LH: loop header
LB: loop body
LE: loop exit
PB: predicated region body
PF: predicated region fallthrough
CT: control target
= control target key end

     0   :  { %9 = vsyncpa [#allocation3], 0  ;;  %s1339_s0 = inlined_call_operand.hbm [shape: f32[8,64], index: 0, kind: input, shape index: {}]   ;;  %s1340_s1 = inlined_call_operand.hbm [shape: f32[64,256], index: 1, kind: input, shape index: {}]   ;;  %s1341_s2 = inlined_call_operand.hbm [shape: bf16[256,640], index: 2, kind: input, shape index: {}]   ;;  %s1342_s3 = inlined_call_operand.hbm [shape: f32[8,256], index: 3, kind: input, shape index: {}]   ;;  %s1343_s4 = inlined_call_operand.hbm [shape: f32[8,128], index: 4, kind: output, shape index: {}]  }
   0x1   :  { %10 = vsyncpa [#allocation6], 0 }
   0x2   :  { %11 = vsyncpa [#allocation9], 0 }
   0x3   :  { %12 = vsyncpa [#allocation4], 0  ;;  %s1276_s15 = smov [#allocation5]  }
   0x4   :  { %s28_s16 = sshll.u32 %s1276_s15, 4  ;;  %s29_s16 = int_to_ptr.vmem [resolvable:$true] %s28_s16 }
   0x5   :  { %s1176_s17 = scalar_lea.vmem %s29_s16, 2048  ;;  %p1181_p1 = scmp.lt.s32.totalorder %s29_s16, %s29_s16 }
   0x6   :  { %p1177_p0 = scmp.ne.s32.totalorder %s29_s16, %s1176_s17  ;;  %p1182_p2 = scmp.lt.s32.totalorder %s1176_s17, %s1176_s17 }
   0x8   :  { %p1183_p3 = por %p1182_p2, %p1181_p1 }
   0xa   :  { %p1184_p4 = pnand %p1183_p3, %p1177_p0 }
   0xc   :  { %1187 = shalt.err (!%p1184_p4)
}
   0xd   :  { %s1277_s18 = smov 256   ;;  %s1278_s19 = smov 16  }
   0xe   :  { %34 = dma.hbm_to_vmem [thread:$0]  %s1340_s1, 2048, %s29_s16, [#allocation6], %s1277_s18, %s1277_s18, %s1278_s19  }
   0xf   :  { %s1279_s22 = smov [#allocation2]   ;;  %s1280_s24 = smov [#allocation7]  }
  0x10   :  { %s19_s23 = sshll.u32 %s1279_s22, 4  ;;  %s40_s25 = sshll.u32 %s1280_s24, 4  ;;  %s20_s23 = int_to_ptr.vmem [resolvable:$true] %s19_s23  ;;  %s41_s25 = int_to_ptr.vmem [resolvable:$true] %s40_s25 }
  0x11   :  { %s1196_s26 = scalar_lea.vmem %s20_s23, 128  ;;  %p1201_p6 = scmp.lt.s32.totalorder %s20_s23, %s20_s23 }
  0x12   :  { %p1197_p5 = scmp.ne.s32.totalorder %s20_s23, %s1196_s26  ;;  %p1202_p7 = scmp.lt.s32.totalorder %s1196_s26, %s1196_s26 }
  0x14   :  { %p1203_p8 = por %p1202_p7, %p1201_p6 }
  0x16   :  { %p1204_p9 = pnand %p1203_p8, %p1197_p5 }
  0x18   :  { %1207 = shalt.err (!%p1204_p9)
}
  0x19   :  { %22 = dma.hbm_to_vmem [thread:$0]  %s1339_s0, 128, %s20_s23, [#allocation3]  }
  0x1a   :  { %s1216_s29 = scalar_lea.vmem %s41_s25, 10240  ;;  %p1221_p11 = scmp.lt.s32.totalorder %s41_s25, %s41_s25 }
  0x1b   :  { %p1217_p10 = scmp.ne.s32.totalorder %s41_s25, %s1216_s29  ;;  %p1222_p12 = scmp.lt.s32.totalorder %s1216_s29, %s1216_s29 }
  0x1d   :  { %p1223_p13 = por %p1222_p12, %p1221_p11 }
  0x1f   :  { %p1224_p0 = pnand %p1223_p13, %p1217_p10 }
  0x21   :  { %1227 = shalt.err (!%p1224_p0)
}
  0x22   :  { %s1281_s1 = smov 320   ;;  %s1282_s30 = smov 20  }
  0x23   :  { %46 = dma.hbm_to_vmem [thread:$0]  %s1341_s2, 10240, %s41_s25, [#allocation6], %s1281_s1, %s1281_s1, %s1282_s30  }
  0x24   :  { %s1283_s7 = smov [#allocation8]  }
  0x25   :  { %s53_s8 = sshll.u32 %s1283_s7, 4  ;;  %s54_s8 = int_to_ptr.vmem [resolvable:$true] %s53_s8 }
  0x26   :  { %s1236_s9 = scalar_lea.vmem %s54_s8, 256  ;;  %p1241_p2 = scmp.lt.s32.totalorder %s54_s8, %s54_s8 }
  0x27   :  { %p1237_p1 = scmp.ne.s32.totalorder %s54_s8, %s1236_s9  ;;  %p1242_p3 = scmp.lt.s32.totalorder %s1236_s9, %s1236_s9 }
  0x29   :  { %p1243_p4 = por %p1242_p3, %p1241_p2 }
  0x2b   :  { %p1244_p5 = pnand %p1243_p4, %p1237_p1 }
  0x2d   :  { %1247 = shalt.err (!%p1244_p5)
}
  0x2e   :  { %56 = dma.hbm_to_vmem [thread:$0]  %s1342_s3, 256, %s54_s8, [#allocation9]  }
  0x2f   :  { %1268 = dma.done.wait [#allocation3], 128  }
  0x30   :  { %1269 = vsyncadd [#allocation3], 4294967168 }
  0x31   :  { %1270 = dma.done.wait [#allocation6], 12288  }
  0x32   :  { %1271 = vsyncadd [#allocation6], 4294955008 }
  0x33   :  { %1272 = dma.done.wait [#allocation9], 256  }
  0x34   :  { %1273 = vsyncadd [#allocation9], 4294967040  ;;  %v1284_v0 = vmov 0.0   ;;  %v86_v1 = vld [vmem:[#allocation5 + $0x78] sm:$0xff]  ;;  %v85_v2 = vld [vmem:[#allocation5 + $0x70] sm:$0xff]  ;;  %vm87_vm0 = vcmask 523264  }
  0x35   :  { %155 = vmatprep.mubr.f32.mxu0 %v1284_v0  ;;  %v84_v3 = vld [vmem:[#allocation5 + $0x68] sm:$0xff]  ;;  %107 = vmatprep.subr.mxu0 %v86_v1  ;;  %v83_v4 = vld [vmem:[#allocation5 + $0x60] sm:$0xff]  ;;  %v82_v5 = vld [vmem:[#allocation5 + $0x58] sm:$0xff]  ;;  %s1286_s2 = smov [#allocation10]  }
  0x36   :  { %108 = vmatpush1.msra.mxu0 %v85_v2  ;;  %v81_v6 = vld [vmem:[#allocation5 + $0x50] sm:$0xff]  ;;  %v80_v7 = vld [vmem:[#allocation5 + $0x48] sm:$0xff]  ;;  %v79_v8 = vld [vmem:[#allocation5 + $0x40] sm:$0xff]  ;;  %s927_s3 = sshll.u32 %s1286_s2, 4  ;;  %s928_s3 = int_to_ptr.vmem [resolvable:$true] %s927_s3 }
  0x37   :  { %109 = vmatprep.subr.mxu0 %v84_v3  ;;  %v78_v9 = vld [vmem:[#allocation5 + $0x38] sm:$0xff]  ;;  %v77_v10 = vld [vmem:[#allocation5 + $0x30] sm:$0xff]  ;;  %v76_v11 = vld [vmem:[#allocation5 + $0x28] sm:$0xff]  ;;  %s1248_s11 = scalar_lea.vmem %s928_s3, 128  ;;  %p1253_p7 = scmp.lt.s32.totalorder %s928_s3, %s928_s3 }
  0x38   :  { %110 = vmatpush1.msra.mxu0 %v83_v4  ;;  %v75_v12 = vld [vmem:[#allocation5 + $0x20] sm:$0xff]  ;;  %v74_v13 = vld [vmem:[#allocation5 + $0x18] sm:$0xff]  ;;  %v73_v14 = vld [vmem:[#allocation5 + $0x10] sm:$0xff]  ;;  %p1249_p6 = scmp.ne.s32.totalorder %s928_s3, %s1248_s11  ;;  %p1254_p8 = scmp.lt.s32.totalorder %s1248_s11, %s1248_s11 }
  0x39   :  { %111 = vmatprep.subr.mxu0 %v82_v5  ;;  %v72_v15 = vld [vmem:[#allocation5 + $0x8] sm:$0xff]  ;;  %v71_v16 = vld [vmem:[#allocation5] sm:$0xff]  ;;  %v70_v17 = vld [vmem:[#allocation2] sm:$0xff] }
  0x3a   :  { %112 = vmatpush1.msra.mxu0 %v81_v6  ;;  %v1052_v18 = vld [vmem:[#allocation7 + $0x11c] ss:$20 sps:$4 sm:$0xff]   ;;  %v1054_v19 = vld [vmem:[#allocation7 + $0x118] ss:$20 sps:$4 sm:$0xff]   ;;  %v1055_v20 = vld [vmem:[#allocation7 + $0xf4] ss:$20 sps:$4 sm:$0xff]   ;;  %p1255_p9 = por %p1254_p8, %p1253_p7 }
  0x3b   :  { %113 = vmatprep.subr.mxu0 %v80_v7  ;;  %456 = vmatprep.subr.bf16.mxu1 %v1052_v18  ;;  %v1057_v21 = vld [vmem:[#allocation7 + $0xf0] ss:$20 sps:$4 sm:$0xff]   ;;  %v1058_v22 = vld [vmem:[#allocation7 + $0xcc] ss:$20 sps:$4 sm:$0xff]   ;;  %v1060_v23 = vld [vmem:[#allocation7 + $0xc8] ss:$20 sps:$4 sm:$0xff]  }
  0x3c   :  { %114 = vmatpush1.msra.mxu0 %v79_v8  ;;  %457 = vmatpush1.bf16.msra.mxu1 %v1054_v19  ;;  %v1061_v24 = vld [vmem:[#allocation7 + $0xa4] ss:$20 sps:$4 sm:$0xff]   ;;  %v1063_v25 = vld [vmem:[#allocation7 + $0xa0] ss:$20 sps:$4 sm:$0xff]   ;;  %v1064_v26 = vld [vmem:[#allocation7 + $0x7c] ss:$20 sps:$4 sm:$0xff]   ;;  %p1256_p10 = pnand %p1255_p9, %p1249_p6 }
  0x3d   :  { %115 = vmatprep.subr.mxu0 %v78_v9  ;;  %458 = vmatprep.subr.bf16.mxu1 %v1055_v20  ;;  %v1066_v27 = vld [vmem:[#allocation7 + $0x78] ss:$20 sps:$4 sm:$0xff]   ;;  %v1067_v28 = vld [vmem:[#allocation7 + $0x54] ss:$20 sps:$4 sm:$0xff]   ;;  %v1069_v29 = vld [vmem:[#allocation7 + $0x50] ss:$20 sps:$4 sm:$0xff]  }
  0x3e   :  { %116 = vmatpush1.msra.mxu0 %v77_v10  ;;  %v1070_v30 = vld [vmem:[#allocation7 + $0x2c] ss:$20 sps:$4 sm:$0xff]   ;;  %v1072_v31 = vld [vmem:[#allocation7 + $0x28] ss:$20 sps:$4 sm:$0xff]   ;;  %v1073_v32 = vld [vmem:[#allocation7 + $0x4] ss:$20 sps:$4 sm:$0xff]  }
  0x3f   :  { %117 = vmatprep.subr.mxu0 %v76_v11  ;;  %v1075_v33 = vld [vmem:[#allocation7] ss:$20 sps:$4 sm:$0xff]   ;;  %v1076_v34 = vld [vmem:[#allocation7 + $0x25c] ss:$20 sps:$4 sm:$0xff]   ;;  %v1078_v35 = vld [vmem:[#allocation7 + $0x258] ss:$20 sps:$4 sm:$0xff]  }
  0x40   :  { %118 = vmatpush1.msra.mxu0 %v75_v12  ;;  %459 = vmatpush1.bf16.msra.mxu1 %v1057_v21  ;;  %v1079_v36 = vld [vmem:[#allocation7 + $0x234] ss:$20 sps:$4 sm:$0xff]   ;;  %v1081_v37 = vld [vmem:[#allocation7 + $0x230] ss:$20 sps:$4 sm:$0xff]   ;;  %v1082_v38 = vld [vmem:[#allocation7 + $0x20c] ss:$20 sps:$4 sm:$0xff]  }
  0x41   :  { %119 = vmatprep.subr.mxu0 %v74_v13  ;;  %460 = vmatprep.subr.bf16.mxu1 %v1058_v22  ;;  %v1084_v39 = vld [vmem:[#allocation7 + $0x208] ss:$20 sps:$4 sm:$0xff]   ;;  %v1085_v40 = vld [vmem:[#allocation7 + $0x1e4] ss:$20 sps:$4 sm:$0xff]   ;;  %v1087_v41 = vld [vmem:[#allocation7 + $0x1e0] ss:$20 sps:$4 sm:$0xff]  }
  0x42   :  { %120 = vmatpush1.msra.mxu0 %v73_v14  ;;  %v1088_v42 = vld [vmem:[#allocation7 + $0x1bc] ss:$20 sps:$4 sm:$0xff]   ;;  %v1090_v43 = vld [vmem:[#allocation7 + $0x1b8] ss:$20 sps:$4 sm:$0xff]   ;;  %v1091_v44 = vld [vmem:[#allocation7 + $0x194] ss:$20 sps:$4 sm:$0xff]  }
  0x43   :  { %121 = vmatprep.subr.mxu0 %v72_v15  ;;  %v1093_v45 = vld [vmem:[#allocation7 + $0x190] ss:$20 sps:$4 sm:$0xff]   ;;  %v1094_v46 = vld [vmem:[#allocation7 + $0x16c] ss:$20 sps:$4 sm:$0xff]   ;;  %v1096_v47 = vld [vmem:[#allocation7 + $0x168] ss:$20 sps:$4 sm:$0xff]  }
  0x44   :  { %122 = vmatpush1.msra.mxu0 %v71_v16  ;;  %461 = vmatpush1.bf16.msra.mxu1 %v1060_v23  ;;  %v1097_v48 = vld [vmem:[#allocation7 + $0x144] ss:$20 sps:$4 sm:$0xff]   ;;  %v1099_v49 = vld [vmem:[#allocation7 + $0x140] ss:$20 sps:$4 sm:$0xff]   ;;  %v1105_v52 = vld [vmem:[#allocation7 + $0xfc] ss:$20 sps:$4 sm:$0xff]  }
  0x45   :  { %938 = vmatmul.mubr.msk.f32.vlgmr.msra.gmra.mxu0 %vm87_vm0, %v70_v17  ;;  %462 = vmatprep.subr.bf16.mxu1 %v1061_v24  ;;  %v1100_v50 = vld [vmem:[#allocation7 + $0x120] ss:$20 sps:$4 sm:$0xff]   ;;  %v1102_v51 = vld [vmem:[#allocation7 + $0x124] ss:$20 sps:$4 sm:$0xff]   ;;  %v1109_v57 = vld [vmem:[#allocation7 + $0xa8] ss:$20 sps:$4 sm:$0xff]  }
  0x46   :  { %706 = vmatprep.subr.bf16.mxu0 %v1102_v51  ;;  %v1103_v53 = vld [vmem:[#allocation7 + $0xf8] ss:$20 sps:$4 sm:$0xff]   ;;  %v1108_v54 = vld [vmem:[#allocation7 + $0xd4] ss:$20 sps:$4 sm:$0xff]   ;;  %v1106_v55 = vld [vmem:[#allocation7 + $0xd0] ss:$20 sps:$4 sm:$0xff]  }
  0x47   :  { %707 = vmatpush1.bf16.msra.mxu0 %v1100_v50  ;;  %v1111_v56 = vld [vmem:[#allocation7 + $0xac] ss:$20 sps:$4 sm:$0xff]   ;;  %v1114_v58 = vld [vmem:[#allocation7 + $0x84] ss:$20 sps:$4 sm:$0xff]   ;;  %v1117_v60 = vld [vmem:[#allocation7 + $0x5c] ss:$20 sps:$4 sm:$0xff]  }
  0x48   :  { %463 = vmatpush1.bf16.msra.mxu1 %v1063_v25  ;;  %708 = vmatprep.subr.bf16.mxu0 %v1105_v52  ;;  %v1112_v59 = vld [vmem:[#allocation7 + $0x80] ss:$20 sps:$4 sm:$0xff]   ;;  %v1115_v61 = vld [vmem:[#allocation7 + $0x58] ss:$20 sps:$4 sm:$0xff]   ;;  %v1118_v63 = vld [vmem:[#allocation7 + $0x30] ss:$20 sps:$4 sm:$0xff]   ;;  %v208_v52 = vlaneseq }
  0x49   :  { %464 = vmatprep.subr.bf16.mxu1 %v1064_v26  ;;  %v1120_v62 = vld [vmem:[#allocation7 + $0x34] ss:$20 sps:$4 sm:$0xff]   ;;  %v1123_v0 = vld [vmem:[#allocation7 + $0xc] ss:$20 sps:$4 sm:$0xff]   ;;  %v1126_v2 = vld [vmem:[#allocation7 + $0x264] ss:$20 sps:$4 sm:$0xff]  }
  0x4a   :  { %v1121_v1 = vld [vmem:[#allocation7 + $0x8] ss:$20 sps:$4 sm:$0xff]   ;;  %v1124_v3 = vld [vmem:[#allocation7 + $0x260] ss:$20 sps:$4 sm:$0xff]   ;;  %v1127_v5 = vld [vmem:[#allocation7 + $0x238] ss:$20 sps:$4 sm:$0xff]  }
  0x4b   :  { %709 = vmatpush1.bf16.msra.mxu0 %v1103_v53  ;;  %v1129_v4 = vld [vmem:[#allocation7 + $0x23c] ss:$20 sps:$4 sm:$0xff]   ;;  %v1132_v6 = vld [vmem:[#allocation7 + $0x214] ss:$20 sps:$4 sm:$0xff]   ;;  %v1135_v8 = vld [vmem:[#allocation7 + $0x1ec] ss:$20 sps:$4 sm:$0xff]  }
  0x4c   :  { %465 = vmatpush1.bf16.msra.mxu1 %v1066_v27  ;;  %710 = vmatprep.subr.bf16.mxu0 %v1108_v54  ;;  %v1130_v7 = vld [vmem:[#allocation7 + $0x210] ss:$20 sps:$4 sm:$0xff]   ;;  %v1133_v9 = vld [vmem:[#allocation7 + $0x1e8] ss:$20 sps:$4 sm:$0xff]   ;;  %v1136_v11 = vld [vmem:[#allocation7 + $0x1c0] ss:$20 sps:$4 sm:$0xff]  }
  0x4d   :  { %466 = vmatprep.subr.bf16.mxu1 %v1067_v28  ;;  %v1138_v10 = vld [vmem:[#allocation7 + $0x1c4] ss:$20 sps:$4 sm:$0xff]   ;;  %v1141_v12 = vld [vmem:[#allocation7 + $0x19c] ss:$20 sps:$4 sm:$0xff]   ;;  %v1285_v50 = vmov 1966171168  }
  0x4e   :  { %v1139_v13 = vld [vmem:[#allocation7 + $0x198] ss:$20 sps:$4 sm:$0xff]   ;;  %v206_v51 = vunpack.c.l.s4 %v1285_v50  ;;  %v209_v54 = vshrl.u32 %v208_v52, 7 }
  0x4f   :  { %711 = vmatpush1.bf16.msra.mxu0 %v1106_v55 }
  0x50   :  { %467 = vmatpush1.bf16.msra.mxu1 %v1069_v29  ;;  %712 = vmatprep.subr.bf16.mxu0 %v1111_v56  ;;  %v207_v53 = vunpack.c.0.s8 %v206_v51 }
  0x51   :  { %468 = vmatprep.subr.bf16.mxu1 %v1070_v30 }
  0x52   :  { %v210_v56 = vsub.s32 %v207_v53, %v209_v54 }
  0x53   :  { %713 = vmatpush1.bf16.msra.mxu0 %v1109_v57 }
  0x54   :  { %469 = vmatpush1.bf16.msra.mxu1 %v1072_v31  ;;  %714 = vmatprep.subr.bf16.mxu0 %v1114_v58 }
  0x55   :  { %470 = vmatprep.subr.bf16.mxu1 %v1073_v32 }
  0x57   :  { %715 = vmatpush1.bf16.msra.mxu0 %v1112_v59 }
  0x58   :  { %471 = vmatpush1.bf16.msra.mxu1 %v1075_v33  ;;  %716 = vmatprep.subr.bf16.mxu0 %v1117_v60  ;;  %v195_v60 = vld [vmem:[#allocation8] ss:$8 sm:$0x3] }
  0x59   :  { %472 = vmatprep.subr.bf16.mxu1 %v1076_v34 }
  0x5b   :  { %717 = vmatpush1.bf16.msra.mxu0 %v1115_v61 }
  0x5c   :  { %473 = vmatpush2.bf16.msra.mxu1 %v1078_v35  ;;  %718 = vmatprep.subr.bf16.mxu0 %v1120_v62  ;;  %v1324_v62 = vsub.s32 0, %v209_v54 }
  0x5d   :  { %474 = vmatprep.subr.bf16.mxu1 %v1079_v36 }
  0x5f   :  { %719 = vmatpush1.bf16.msra.mxu0 %v1118_v63  ;;  %v1326_v63 = vsub.s32 1, %v209_v54 }
  0x60   :  { %475 = vmatpush2.bf16.msra.mxu1 %v1081_v37  ;;  %720 = vmatprep.subr.bf16.mxu0 %v1123_v0  ;;  %v197_v0 = vld [vmem:[#allocation8 + $0x1] ss:$8 sm:$0x3] }
  0x61   :  { %476 = vmatprep.subr.bf16.mxu1 %v1082_v38 }
  0x63   :  { %721 = vmatpush1.bf16.msra.mxu0 %v1121_v1 }
  0x64   :  { %477 = vmatpush2.bf16.msra.mxu1 %v1084_v39  ;;  %722 = vmatprep.subr.bf16.mxu0 %v1126_v2 }
  0x65   :  { %478 = vmatprep.subr.bf16.mxu1 %v1085_v40 }
  0x67   :  { %723 = vmatpush2.bf16.msra.mxu0 %v1124_v3  ;;  %v238_v3 = vrot.slane %v197_v0, %v1324_v62 }
  0x68   :  { %479 = vmatpush2.bf16.msra.mxu1 %v1087_v41  ;;  %724 = vmatprep.subr.bf16.mxu0 %v1129_v4  ;;  %v242_v4 = vrot.slane %v197_v0, %v1326_v63 }
  0x69   :  { %480 = vmatprep.subr.bf16.mxu1 %v1088_v42 }
  0x6b   :  { %725 = vmatpush2.bf16.msra.mxu0 %v1127_v5 }
  0x6c   :  { %481 = vmatpush2.bf16.msra.mxu1 %v1090_v43  ;;  %726 = vmatprep.subr.bf16.mxu0 %v1132_v6 }
  0x6d   :  { %482 = vmatprep.subr.bf16.mxu1 %v1091_v44 }
  0x6f   :  { %727 = vmatpush2.bf16.msra.mxu0 %v1130_v7 }
  0x70   :  { %483 = vmatpush2.bf16.msra.mxu1 %v1093_v45  ;;  %728 = vmatprep.subr.bf16.mxu0 %v1135_v8 }
  0x71   :  { %484 = vmatprep.subr.bf16.mxu1 %v1094_v46 }
  0x73   :  { %729 = vmatpush2.bf16.msra.mxu0 %v1133_v9 }
  0x74   :  { %485 = vmatpush2.bf16.msra.mxu1 %v1096_v47  ;;  %730 = vmatprep.subr.bf16.mxu0 %v1138_v10 }
  0x75   :  { %486 = vmatprep.subr.bf16.mxu1 %v1097_v48 }
  0x77   :  { %731 = vmatpush2.bf16.msra.mxu0 %v1136_v11 }
  0x78   :  { %487 = vmatpush2.bf16.msra.mxu1 %v1099_v49  ;;  %732 = vmatprep.subr.bf16.mxu0 %v1141_v12 }
  0x7b   :  { %733 = vmatpush2.bf16.msra.mxu0 %v1139_v13 }
 0x105   :  { %v157_v14 = vpop.f32.mrf.mxu0 }
 0x106   :  { %v162_v15 = vrot.slane %v157_v14, 4 }
 0x107   :  { %v159_v16 = vpop.f32.mrf.mxu0 }
 0x108   :  { %v163_v17 = vadd.f32 %v162_v15, %v157_v14  ;;  %v168_v18 = vrot.slane %v159_v16, 4  ;;  %v1142_v15 = vld [vmem:[#allocation7 + $0x170] ss:$20 sps:$4 sm:$0xff]  }
 0x10a   :  { %v164_v19 = vrot.slane %v163_v17, 2  ;;  %v169_v20 = vadd.f32 %v168_v18, %v159_v16  ;;  %v1148_v18 = vld [vmem:[#allocation7 + $0x268] ss:$20 sps:$4 sm:$0xff]  }
 0x10b   :  { %1019 = vmatprep.subr.bf16.mxu1 %v1148_v18 }
 0x10c   :  { %v165_v21 = vadd.f32 %v164_v19, %v163_v17  ;;  %v170_v22 = vrot.slane %v169_v20, 2  ;;  %v1145_v17 = vld [vmem:[#allocation7 + $0x148] ss:$20 sps:$4 sm:$0xff]  }
 0x10d   :  { %v1149_v19 = vld [vmem:[#allocation7 + $0x128] ss:$20 sps:$4 sm:$0xff]  }
 0x10e   :  { %v166_v23 = vrot.slane %v165_v21, 1  ;;  %v171_v24 = vadd.f32 %v170_v22, %v169_v20  ;;  %v1150_v20 = vld [vmem:[#allocation7 + $0x240] ss:$20 sps:$4 sm:$0xff]   ;;  %v1152_v22 = vld [vmem:[#allocation7 + $0x218] ss:$20 sps:$4 sm:$0xff]  }
 0x110   :  { %v167_v25 = vadd.f32 %v166_v23, %v165_v21  ;;  %v172_v26 = vrot.slane %v171_v24, 1  ;;  %v1151_v21 = vld [vmem:[#allocation7 + $0x100] ss:$20 sps:$4 sm:$0xff]   ;;  %v1153_v23 = vld [vmem:[#allocation7 + $0xd8] ss:$20 sps:$4 sm:$0xff]  }
 0x112   :  { %v175_v27 = vmul.f32 0.125, %v167_v25  ;;  %v173_v28 = vadd.f32 %v172_v26, %v171_v24  ;;  %v1154_v24 = vld [vmem:[#allocation7 + $0x1f0] ss:$20 sps:$4 sm:$0xff]   ;;  %v1156_v26 = vld [vmem:[#allocation7 + $0x1c8] ss:$20 sps:$4 sm:$0xff]  }
 0x113   :  { %v1155_v25 = vld [vmem:[#allocation7 + $0xb0] ss:$20 sps:$4 sm:$0xff]  }
 0x114   :  { %v177_v29 = vsub.f32 %v157_v14, %v175_v27  ;;  %v176_v30 = vmul.f32 0.125, %v173_v28  ;;  %v1144_v14 = vld [vmem:[#allocation7 + $0x174] ss:$20 sps:$4 sm:$0xff]  }
 0x115   :  { %734 = vmatprep.subr.bf16.mxu0 %v1144_v14  ;;  %v1157_v27 = vld [vmem:[#allocation7 + $0x88] ss:$20 sps:$4 sm:$0xff]   ;;  %v1158_v28 = vld [vmem:[#allocation7 + $0x1a0] ss:$20 sps:$4 sm:$0xff]  }
 0x116   :  { %v179_v31 = vmul.f32 %v177_v29, %v177_v29  ;;  %v178_v32 = vsub.f32 %v159_v16, %v176_v30  ;;  %735 = vmatpush2.bf16.msra.mxu0 %v1142_v15  ;;  %v1147_v16 = vld [vmem:[#allocation7 + $0x14c] ss:$20 sps:$4 sm:$0xff]  }
 0x117   :  { %736 = vmatprep.subr.bf16.mxu0 %v1147_v16  ;;  %v284_v30 = vld [vmem:[#allocation8 + $0x2] ss:$8 sm:$0x3] }
 0x118   :  { %v181_v33 = vrot.slane %v179_v31, 4  ;;  %v180_v34 = vmul.f32 %v178_v32, %v178_v32 }
 0x11a   :  { %v182_v35 = vadd.f32 %v181_v33, %v179_v31  ;;  %v187_v36 = vrot.slane %v180_v34, 4  ;;  %737 = vmatpush2.bf16.msra.mxu0 %v1145_v17  ;;  %v289_v31 = vrot.slane %v284_v30, %v1324_v62 }
 0x11c   :  { %v183_v37 = vrot.slane %v182_v35, 2  ;;  %v188_v38 = vadd.f32 %v187_v36, %v180_v34 }
 0x11e   :  { %v184_v39 = vadd.f32 %v183_v37, %v182_v35  ;;  %v189_v40 = vrot.slane %v188_v38, 2 }
 0x120   :  { %v185_v41 = vrot.slane %v184_v39, 1  ;;  %v190_v42 = vadd.f32 %v189_v40, %v188_v38 }
 0x122   :  { %v186_v43 = vadd.f32 %v185_v41, %v184_v39  ;;  %v191_v44 = vrot.slane %v190_v42, 1 }
 0x124   :  { %v193_v45 = vmul.f32 0.125, %v186_v43  ;;  %v192_v46 = vadd.f32 %v191_v44, %v190_v42  ;;  %v1160_v43 = vld [vmem:[#allocation7 + $0x178] ss:$20 sps:$4 sm:$0xff]  }
 0x125   :  { %v1161_v44 = vld [vmem:[#allocation7 + $0x38] ss:$20 sps:$4 sm:$0xff]  }
 0x126   :  { %v198_v47 = vadd.f32 1e-05, %v193_v45  ;;  %v194_v48 = vmul.f32 0.125, %v192_v46  ;;  %v1162_v45 = vld [vmem:[#allocation7 + $0x150] ss:$20 sps:$4 sm:$0xff]  }
 0x127   :  { %v1163_v46 = vld [vmem:[#allocation7 + $0x10] ss:$20 sps:$4 sm:$0xff]  }
 0x128   :  { %v199_v49 = vadd.f32 1e-05, %v194_v48  ;;  %1164 = vrsqrt.f32 %v198_v47  ;;  %v534_v47 = vld [vmem:[#allocation8 + $0x3] ss:$8 sm:$0x3] }
 0x129   :  { %v539_v48 = vrot.slane %v534_v47, %v1324_v62 }
 0x12a   :  { %1166 = vrsqrt.f32 %v199_v49  ;;  %v543_v49 = vrot.slane %v534_v47, %v1326_v63 }
 0x135   :  { %v1165_v55 = vpop.eup %1164 }
 0x137   :  { %v1167_v57 = vpop.eup %1166 }
 0x138   :  { %v204_v58 = vcombine.low %v1165_v55, %v1167_v57 }
 0x13a   :  { %v211_v59 = vrot.slane %v204_v58, %v210_v56 }
 0x13c   :  { %v218_v61 = vrot.slane %v211_v59, %v210_v56 }
 0x13e   :  { %v220_v1 = vmul.f32 %v218_v61, %v195_v60  ;;  %v783_v61 = vld [vmem:[#allocation8 + $0x4] ss:$0 sm:$0xff] }
 0x140   :  { %v229_v2 = vrot.slane %v220_v1, %v1326_v63  ;;  %v225_v5 = vrot.slane %v220_v1, %v1324_v62 }
 0x142   :  { %v233_v6 = vmul.f32 %v229_v2, %v178_v32  ;;  %v232_v7 = vmul.f32 %v225_v5, %v177_v29  ;;  %v1159_v29 = vld [vmem:[#allocation7 + $0x60] ss:$20 sps:$4 sm:$0xff]   ;;  %v293_v32 = vrot.slane %v284_v30, %v1326_v63 }
 0x144   :  { %v246_v8 = vadd.f32 %v242_v4, %v233_v6  ;;  %v245_v9 = vadd.f32 %v238_v3, %v232_v7 }
 0x146   :  { %v248_v10 = vmax.f32 %v246_v8, 0.0  ;;  %v247_v11 = vmax.f32 %v245_v9, 0.0 }
 0x148   :  { %v282_v12 = vpack.c.bf16 %v248_v10, %v248_v10  ;;  %v281_v13 = vpack.c.bf16 %v247_v11, %v247_v11 }
 0x14a   :  { %488 = vmatprep.mubr.bf16.mxu1 %v282_v12 }
 0x14b   :  { %489 = vmatmul.mubr.bf16.vlgmr.msra.gmra.mxu1 %v281_v13 }
 0x14c   :  { %1020 = vmatpush3.bf16.msra.mxu1 %v1149_v19 }
 0x14d   :  { %1021 = vmatprep.subr.bf16.mxu1 %v1150_v20 }
 0x150   :  { %1022 = vmatpush3.bf16.msra.mxu1 %v1151_v21 }
 0x151   :  { %1023 = vmatprep.subr.bf16.mxu1 %v1152_v22 }
 0x154   :  { %1024 = vmatpush3.bf16.msra.mxu1 %v1153_v23 }
 0x155   :  { %1025 = vmatprep.subr.bf16.mxu1 %v1154_v24 }
 0x158   :  { %1026 = vmatpush3.bf16.msra.mxu1 %v1155_v25 }
 0x159   :  { %1027 = vmatprep.subr.bf16.mxu1 %v1156_v26 }
 0x15c   :  { %1028 = vmatpush3.bf16.msra.mxu1 %v1157_v27 }
 0x15d   :  { %1029 = vmatprep.subr.bf16.mxu1 %v1158_v28 }
 0x160   :  { %1030 = vmatpush3.bf16.msra.mxu1 %v1159_v29 }
 0x161   :  { %1031 = vmatprep.subr.bf16.mxu1 %v1160_v43 }
 0x164   :  { %1032 = vmatpush3.bf16.msra.mxu1 %v1161_v44 }
 0x165   :  { %1033 = vmatprep.subr.bf16.mxu1 %v1162_v45 }
 0x168   :  { %1034 = vmatpush3.bf16.msra.mxu1 %v1163_v46 }
 0x20b   :  { %v490_v33 = vpop.f32.mrf.mxu1 }
 0x20c   :  { %v491_v34 = vadd.f32 %v490_v33, %v289_v31 }
 0x20d   :  { %v492_v35 = vpop.f32.mrf.mxu1 }
 0x20e   :  { %v493_v36 = vadd.f32 %v492_v35, %v293_v32  ;;  %v497_v37 = vmax.f32 %v491_v34, 0.0 }
 0x20f   :  { %v494_v38 = vpop.f32.mrf.mxu1 }
 0x210   :  { %v498_v39 = vmax.f32 %v493_v36, 0.0  ;;  %v531_v42 = vpack.c.bf16 %v497_v37, %v497_v37 }
 0x211   :  { %v495_v40 = vpop.f32.mrf.mxu1 }
 0x212   :  { %v532_v41 = vpack.c.bf16 %v498_v39, %v498_v39 }
 0x214   :  { %738 = vmatprep.mubr.bf16.mxu0 %v532_v41 }
 0x215   :  { %739 = vmatmul.mubr.bf16.vlgmr.msra.gmra.mxu0 %v531_v42 }
 0x2d5   :  { %v740_v50 = vpop.f32.mrf.mxu0 }
 0x2d6   :  { %v741_v51 = vadd.f32 %v740_v50, %v539_v48 }
 0x2d7   :  { %v742_v52 = vpop.f32.mrf.mxu0 }
 0x2d8   :  { %v743_v53 = vadd.f32 %v742_v52, %v543_v49  ;;  %v747_v54 = vmax.f32 %v741_v51, 0.0 }
 0x2d9   :  { %v744_v55 = vpop.f32.mrf.mxu0 }
 0x2da   :  { %v748_v56 = vmax.f32 %v743_v53, 0.0  ;;  %v781_v59 = vpack.c.bf16 %v747_v54, %v747_v54 }
 0x2db   :  { %v745_v57 = vpop.f32.mrf.mxu0 }
 0x2dc   :  { %v782_v58 = vpack.c.bf16 %v748_v56, %v748_v56 }
 0x2de   :  { %912 = vmatprep.mubr.bf16.mxu1 %v782_v58 }
 0x2df   :  { %913 = vmatmul.mubr.bf16.vlgmr.msra.gmra.mxu1 %v781_v59 }
 0x39f   :  { %v1035_v60 = vpop.f32.mrf.mxu1 }
 0x3a1   :  { %v1036_v0 = vpop.f32.mrf.mxu1 }
 0x3a2   :  { %v1037_v62 = vadd.f32 %v1036_v0, %v1035_v60 }
 0x3a3   :  { %v1038_v1 = vpop.f32.mrf.mxu1 }
 0x3a4   :  { %v915_v63 = vadd.f32 %v1037_v62, %v783_v61 }
 0x3a5   :  { %v1039_v2 = vpop.f32.mrf.mxu1 }
 0x3a6   :  { %920 = vst [vmem:[#allocation10] sm:$0xff] %v915_v63 }
 0x3a7   :  { %1259 = shalt.err (!%p1256_p10)
}
 0x3a8   :  { %930 = dma.vmem_to_hbm [thread:$0]  %s928_s3, 128, %s1343_s4, [#allocation4]  }
 0x3a9   :  { %1274 = dma.done.wait [#allocation4], 128  }
 0x3aa   :  { %1275 = vsyncadd [#allocation4], 4294967168 }
 0x3ab   :  { %934 = vsyncpa [#allocation3], 1 }
 0x3ac   :  { %935 = vsyncpa [#allocation6], 1 }
 0x3ad   :  { %936 = vsyncpa [#allocation9], 1 }
 0x3ae   :  { %937 = vsyncpa [#allocation4], 1 }

</bundles_post_ra>
